<compile_context>
chip_gen: v5e
topology: v5e:2x2
jax: 0.10.0
libtpu: 0.0.40
codegen_flags: <defaults>
</compile_context>

<pallas_src>
import functools

import jax
import jax.numpy as jnp
from jax import lax
from jax.experimental import pallas as pl
from jax.experimental.pallas import tpu as pltpu


def _tile_lanes(v, reps):
    """Replicate `v` `reps` times along the lane axis with log-depth concatenation."""
    out, built = v, 1
    while built * 2 <= reps:
        out = jnp.concatenate([out, out], axis=-1)
        built *= 2
    if built < reps:
        out = jnp.concatenate([out] + [v] * (reps - built), axis=-1)
    return out


def _sepconv_kernel(x_ref, dwv_ref, pwv_ref, o_ref, *,
                    kh_size, kw_size, cin, cout, stride, dilation,
                    h_out, w_out, w_pad, lanes, nb):
    """Fused depthwise + pointwise conv for `nb` batch elements.

    x_ref  : (nb, h_pad, lanes)       input, (c, w) flattened + zero-padded on the lane axis
    dwv_ref: (KH*KW, lanes)           per-tap depthwise weights pre-tiled over (c, w), f32
    pwv_ref: (cin, cout*w_out)        pointwise weights pre-tiled over (co, w_out), f32
    o_ref  : (nb, h_out, cout*w_out)  lane-dense output block (one unmasked store per bi)
    """
    col_span = (w_out - 1) * stride + 1
    n_taps = kh_size * kw_size

    # Hoist the (tiny) weight loads out of the per-batch loop.
    dwv = [dwv_ref[t, :] for t in range(n_taps)]
    pwv = [pwv_ref[c, :] for c in range(cin)]

    for bi in range(nb):
        # --- depthwise conv: kh aligned full-width slab loads, kw lane shifts on the XLU ---
        acc = None
        for kh in range(kh_size):
            h0 = kh * dilation
            rows = pl.ds(h0, h_out) if stride == 1 else pl.ds(h0, h_out, stride)
            slab = x_ref[bi, rows, :].astype(jnp.float32)        # (h_out, lanes), aligned, one cast
            for kw in range(kw_size):
                d = kw * dilation
                # Logical left shift by d lanes (wrapped lanes land beyond the last lane
                # ever read by the pointwise extraction below, see wrapper layout).
                shifted = slab if d == 0 else pltpu.roll(slab, lanes - d, axis=1)
                term = shifted * dwv[kh * kw_size + kw]
                acc = term if acc is None else acc + term

        # --- pointwise 1x1 conv: cin full-width VPU FMAs, one unmasked lane-dense store ---
        out = None
        for c in range(cin):
            if stride == 1:
                col_c = acc[:, c * w_pad:c * w_pad + w_out]
            else:
                # TODO(synk): lane-strided decimation goes through the XLU; for strided
                # configs decimate earlier / emit a compact stride-1 layout (untested path).
                col_c = acc[:, c * w_pad:c * w_pad + col_span:stride]
            rep_c = _tile_lanes(col_c, cout)                     # (h_out, cout*w_out)
            term = rep_c * pwv[c]
            out = term if out is None else out + term
        o_ref[bi, :, :] = out.astype(o_ref.dtype)


def _tensorcores_per_chip():
    """Best-effort TensorCores-per-chip count (v7x has 2); safe default is 1."""
    try:
        kind = jax.devices()[0].device_kind.lower()
    except Exception:
        return 1
    return 2 if ("v7" in kind or "tpu7" in kind) else 1


def separable_conv2d(x_nchw, dw_weight, pw_weight, *, stride=1, padding=0, dilation=1):
    """x_nchw: (N, C, H, W); dw_weight: (C, 1, KH, KW); pw_weight: (Cout, C, 1, 1)."""
    n, cin, h, w = x_nchw.shape
    kh, kw = int(dw_weight.shape[2]), int(dw_weight.shape[3])
    cout = int(pw_weight.shape[0])

    h_out = (h + 2 * padding - dilation * (kh - 1) - 1) // stride + 1
    w_out = (w + 2 * padding - dilation * (kw - 1) - 1) // stride + 1
    h_pad, w_pad = h + 2 * padding, w + 2 * padding
    flat_w = cin * w_pad                                   # flattened (c, w) lane width
    lanes = max(128, ((flat_w + 127) // 128) * 128)        # pad lane axis to full vregs

    # ---- input: NCHW -> (N, H_pad, lanes); transpose + pads fuse into one HBM copy ----
    x_t = jnp.transpose(x_nchw, (0, 2, 1, 3))                                    # (N, H, C, W)
    x_t = jnp.pad(x_t, ((0, 0), (padding, padding), (0, 0), (padding, padding)))
    x_flat = x_t.reshape(n, h_pad, flat_w)
    if lanes > flat_w:
        x_flat = jnp.pad(x_flat, ((0, 0), (0, 0), (0, lanes - flat_w)))

    # ---- weights: hoist every broadcast / cast out of the kernel ----
    # depthwise: per-tap lane vectors over the flattened (c, w) axis, zero-padded to `lanes`
    dw_taps = jnp.transpose(dw_weight[:, 0, :, :], (1, 2, 0)).reshape(kh * kw, cin)
    dwv = jnp.repeat(dw_taps[:, :, None], w_pad, axis=2).reshape(kh * kw, flat_w)
    dwv = jnp.pad(dwv, ((0, 0), (0, lanes - flat_w))).astype(jnp.float32)        # (KH*KW, lanes)
    # pointwise: per-input-channel lane vectors over the flattened (co, w_out) output axis
    pw_cc = pw_weight[:, :, 0, 0].astype(jnp.float32)                            # (Cout, Cin)
    pwv = jnp.repeat(pw_cc.T[:, :, None], w_out, axis=2).reshape(cin, cout * w_out)

    # ---- batches per grid step: fold batch on 1-TC parts, keep >=2-way grid on v7x ----
    n_tc = _tensorcores_per_chip()
    itemsize = x_nchw.dtype.itemsize
    per_batch_bytes = (h_pad * lanes + h_out * cout * w_out) * itemsize
    nb = max(1, min(n, (4 * 1024 * 1024) // max(per_batch_bytes, 1)))  # keep blocks small
    if n_tc > 1 and n > 1:
        nb = min(nb, max(1, n // n_tc))     # leave >= n_tc parallel grid steps for megacore
    while n % nb:
        nb -= 1
    grid = (n // nb,)

    kernel = functools.partial(
        _sepconv_kernel, kh_size=kh, kw_size=kw, cin=cin, cout=cout,
        stride=stride, dilation=dilation, h_out=h_out, w_out=w_out,
        w_pad=w_pad, lanes=lanes, nb=nb)

    flops = int(2 * n * h_out * (kh * kw * lanes + cin * cout * w_out))
    bytes_accessed = int(n * h_pad * lanes * itemsize + dwv.size * 4 + pwv.size * 4
                         + n * h_out * cout * w_out * itemsize)

    out_flat = pl.pallas_call(
        kernel,
        out_shape=jax.ShapeDtypeStruct((n, h_out, cout * w_out), x_nchw.dtype),
        grid_spec=pltpu.PrefetchScalarGridSpec(
            num_scalar_prefetch=0,
            grid=grid,
            in_specs=[
                pl.BlockSpec((nb, h_pad, lanes), lambda b: (b, 0, 0)),
                pl.BlockSpec((kh * kw, lanes), lambda b: (0, 0)),
                pl.BlockSpec((cin, cout * w_out), lambda b: (0, 0)),
            ],
            out_specs=pl.BlockSpec((nb, h_out, cout * w_out), lambda b: (b, 0, 0)),
        ),
        compiler_params=pltpu.CompilerParams(
            dimension_semantics=("parallel",),
            vmem_limit_bytes=32 * 1024 * 1024,   # explicit budget; safe on v5e/v6e/v7x
        ),
        cost_estimate=pl.CostEstimate(flops=flops, transcendentals=0,
                                      bytes_accessed=bytes_accessed),
    )(x_flat, dwv, pwv)

    # ---- output: (N, H_out, Cout*W_out) -> NCHW (kept to match nn.Conv2d semantics) ----
    return jnp.transpose(out_flat.reshape(n, h_out, cout, w_out), (0, 2, 1, 3))


def _reference(x_nchw, dw_weight, pw_weight, *, stride, padding, dilation):
    c = x_nchw.shape[1]
    dn = ("NCHW", "OIHW", "NCHW")
    y = lax.conv_general_dilated(
        x_nchw, dw_weight, window_strides=(stride, stride),
        padding=[(padding, padding), (padding, padding)],
        rhs_dilation=(dilation, dilation), dimension_numbers=dn,
        feature_group_count=c)
    y = lax.conv_general_dilated(
        y, pw_weight, window_strides=(1, 1), padding=[(0, 0), (0, 0)],
        dimension_numbers=dn)
    return y


if __name__ == "__main__":
    # module config: SeparableConv2d(in_channels=4, out_channels=8, kernel_size=3,
    #                                stride=1, padding=1, dilation=1, bias=False)
    in_channels, out_channels, ksize = 4, 8, 3
    stride, padding, dilation = 1, 1, 1

    key = jax.random.PRNGKey(0)
    kx, kdw, kpw = jax.random.split(key, 3)

    x = jax.random.normal(kx, (2, in_channels, 16, 16), dtype=jnp.float32)
    dw_w = jax.random.normal(kdw, (in_channels, 1, ksize, ksize), dtype=jnp.float32) * 0.1
    pw_w = jax.random.normal(kpw, (out_channels, in_channels, 1, 1), dtype=jnp.float32) * 0.1

    out = separable_conv2d(x, dw_w, pw_w, stride=stride, padding=padding, dilation=dilation)
    out = jax.block_until_ready(out)

    ref = _reference(x, dw_w, pw_w, stride=stride, padding=padding, dilation=dilation)
    assert out.shape == ref.shape, (out.shape, ref.shape)
    assert jnp.allclose(out, ref, atol=1e-4, rtol=1e-4), "mismatch vs lax.conv reference"

    print("KERNEL_OK")
</pallas_src>

<mosaic_0001>
module attributes {stable_mosaic.version = 11 : i64} {
  func.func @_sepconv_kernel(%arg0: i32, %arg1: memref<2x18x128xf32, #tpu.memory_space<vmem>>, %arg2: memref<9x128xf32, #tpu.memory_space<vmem>>, %arg3: memref<4x128xf32, #tpu.memory_space<vmem>>, %arg4: memref<2x16x128xf32, #tpu.memory_space<vmem>>) attributes {dimension_semantics = [#tpu.dimension_semantics<parallel>], iteration_bounds = array<i64: 1>, scalar_prefetch = 0 : i64, scratch_operands = 0 : i64, tpu.core_type = #tpu.core_type<tc>, window_params = [{transform_indices = @transform_0, window_bounds = array<i64: 2, 18, 128>}, {pipeline_mode = #tpu.pipeline_mode<synchronous>, transform_indices = @transform_1, window_bounds = array<i64: 9, 128>}, {pipeline_mode = #tpu.pipeline_mode<synchronous>, transform_indices = @transform_2, window_bounds = array<i64: 4, 128>}, {transform_indices = @transform_3, window_bounds = array<i64: 2, 16, 128>}]} {
    %c0 = arith.constant 0 : index
    %c0_0 = arith.constant 0 : index
    %0 = vector.load %arg2[%c0, %c0_0] : memref<9x128xf32, #tpu.memory_space<vmem>>, vector<1x128xf32>
    %1 = vector.shape_cast %0 : vector<1x128xf32> to vector<128xf32>
    %c1 = arith.constant 1 : index
    %c0_1 = arith.constant 0 : index
    %2 = vector.load %arg2[%c1, %c0_1] : memref<9x128xf32, #tpu.memory_space<vmem>>, vector<1x128xf32>
    %3 = vector.shape_cast %2 : vector<1x128xf32> to vector<128xf32>
    %c2 = arith.constant 2 : index
    %c0_2 = arith.constant 0 : index
    %4 = vector.load %arg2[%c2, %c0_2] : memref<9x128xf32, #tpu.memory_space<vmem>>, vector<1x128xf32>
    %5 = vector.shape_cast %4 : vector<1x128xf32> to vector<128xf32>
    %c3 = arith.constant 3 : index
    %c0_3 = arith.constant 0 : index
    %6 = vector.load %arg2[%c3, %c0_3] : memref<9x128xf32, #tpu.memory_space<vmem>>, vector<1x128xf32>
    %7 = vector.shape_cast %6 : vector<1x128xf32> to vector<128xf32>
    %c4 = arith.constant 4 : index
    %c0_4 = arith.constant 0 : index
    %8 = vector.load %arg2[%c4, %c0_4] : memref<9x128xf32, #tpu.memory_space<vmem>>, vector<1x128xf32>
    %9 = vector.shape_cast %8 : vector<1x128xf32> to vector<128xf32>
    %c5 = arith.constant 5 : index
    %c0_5 = arith.constant 0 : index
    %10 = vector.load %arg2[%c5, %c0_5] : memref<9x128xf32, #tpu.memory_space<vmem>>, vector<1x128xf32>
    %11 = vector.shape_cast %10 : vector<1x128xf32> to vector<128xf32>
    %c6 = arith.constant 6 : index
    %c0_6 = arith.constant 0 : index
    %12 = vector.load %arg2[%c6, %c0_6] : memref<9x128xf32, #tpu.memory_space<vmem>>, vector<1x128xf32>
    %13 = vector.shape_cast %12 : vector<1x128xf32> to vector<128xf32>
    %c7 = arith.constant 7 : index
    %c0_7 = arith.constant 0 : index
    %14 = vector.load %arg2[%c7, %c0_7] : memref<9x128xf32, #tpu.memory_space<vmem>>, vector<1x128xf32>
    %15 = vector.shape_cast %14 : vector<1x128xf32> to vector<128xf32>
    %c8 = arith.constant 8 : index
    %c0_8 = arith.constant 0 : index
    %16 = vector.load %arg2[%c8, %c0_8] : memref<9x128xf32, #tpu.memory_space<vmem>>, vector<1x128xf32>
    %17 = vector.shape_cast %16 : vector<1x128xf32> to vector<128xf32>
    %c0_9 = arith.constant 0 : index
    %c0_10 = arith.constant 0 : index
    %18 = vector.load %arg3[%c0_9, %c0_10] : memref<4x128xf32, #tpu.memory_space<vmem>>, vector<1x128xf32>
    %19 = vector.shape_cast %18 : vector<1x128xf32> to vector<128xf32>
    %c1_11 = arith.constant 1 : index
    %c0_12 = arith.constant 0 : index
    %20 = vector.load %arg3[%c1_11, %c0_12] : memref<4x128xf32, #tpu.memory_space<vmem>>, vector<1x128xf32>
    %21 = vector.shape_cast %20 : vector<1x128xf32> to vector<128xf32>
    %c2_13 = arith.constant 2 : index
    %c0_14 = arith.constant 0 : index
    %22 = vector.load %arg3[%c2_13, %c0_14] : memref<4x128xf32, #tpu.memory_space<vmem>>, vector<1x128xf32>
    %23 = vector.shape_cast %22 : vector<1x128xf32> to vector<128xf32>
    %c3_15 = arith.constant 3 : index
    %c0_16 = arith.constant 0 : index
    %24 = vector.load %arg3[%c3_15, %c0_16] : memref<4x128xf32, #tpu.memory_space<vmem>>, vector<1x128xf32>
    %25 = vector.shape_cast %24 : vector<1x128xf32> to vector<128xf32>
    %c0_17 = arith.constant 0 : index
    %c0_18 = arith.constant 0 : index
    %c0_19 = arith.constant 0 : index
    %26 = vector.load %arg1[%c0_17, %c0_18, %c0_19] : memref<2x18x128xf32, #tpu.memory_space<vmem>>, vector<1x16x128xf32>
    %27 = vector.shape_cast %26 : vector<1x16x128xf32> to vector<16x128xf32>
    %28 = vector.shape_cast %1 : vector<128xf32> to vector<1x128xf32>
    %29 = vector.broadcast %28 : vector<1x128xf32> to vector<16x128xf32>
    %30 = arith.mulf %27, %29 : vector<16x128xf32>
    %c127_i32 = arith.constant 127 : i32
    %31 = tpu.dynamic_rotate %27 by %c127_i32 dim 1 : vector<16x128xf32>, i32 -> vector<16x128xf32>
    %32 = vector.shape_cast %3 : vector<128xf32> to vector<1x128xf32>
    %33 = vector.broadcast %32 : vector<1x128xf32> to vector<16x128xf32>
    %34 = arith.mulf %31, %33 : vector<16x128xf32>
    %35 = arith.addf %30, %34 : vector<16x128xf32>
    %c126_i32 = arith.constant 126 : i32
    %36 = tpu.dynamic_rotate %27 by %c126_i32 dim 1 : vector<16x128xf32>, i32 -> vector<16x128xf32>
    %37 = vector.shape_cast %5 : vector<128xf32> to vector<1x128xf32>
    %38 = vector.broadcast %37 : vector<1x128xf32> to vector<16x128xf32>
    %39 = arith.mulf %36, %38 : vector<16x128xf32>
    %40 = arith.addf %35, %39 : vector<16x128xf32>
    %c0_20 = arith.constant 0 : index
    %c1_21 = arith.constant 1 : index
    %c0_22 = arith.constant 0 : index
    %41 = vector.load %arg1[%c0_20, %c1_21, %c0_22] : memref<2x18x128xf32, #tpu.memory_space<vmem>>, vector<1x16x128xf32>
    %42 = vector.shape_cast %41 : vector<1x16x128xf32> to vector<16x128xf32>
    %43 = vector.shape_cast %7 : vector<128xf32> to vector<1x128xf32>
    %44 = vector.broadcast %43 : vector<1x128xf32> to vector<16x128xf32>
    %45 = arith.mulf %42, %44 : vector<16x128xf32>
    %46 = arith.addf %40, %45 : vector<16x128xf32>
    %c127_i32_23 = arith.constant 127 : i32
    %47 = tpu.dynamic_rotate %42 by %c127_i32_23 dim 1 : vector<16x128xf32>, i32 -> vector<16x128xf32>
    %48 = vector.shape_cast %9 : vector<128xf32> to vector<1x128xf32>
    %49 = vector.broadcast %48 : vector<1x128xf32> to vector<16x128xf32>
    %50 = arith.mulf %47, %49 : vector<16x128xf32>
    %51 = arith.addf %46, %50 : vector<16x128xf32>
    %c126_i32_24 = arith.constant 126 : i32
    %52 = tpu.dynamic_rotate %42 by %c126_i32_24 dim 1 : vector<16x128xf32>, i32 -> vector<16x128xf32>
    %53 = vector.shape_cast %11 : vector<128xf32> to vector<1x128xf32>
    %54 = vector.broadcast %53 : vector<1x128xf32> to vector<16x128xf32>
    %55 = arith.mulf %52, %54 : vector<16x128xf32>
    %56 = arith.addf %51, %55 : vector<16x128xf32>
    %c0_25 = arith.constant 0 : index
    %c2_26 = arith.constant 2 : index
    %c0_27 = arith.constant 0 : index
    %57 = vector.load %arg1[%c0_25, %c2_26, %c0_27] : memref<2x18x128xf32, #tpu.memory_space<vmem>>, vector<1x16x128xf32>
    %58 = vector.shape_cast %57 : vector<1x16x128xf32> to vector<16x128xf32>
    %59 = vector.shape_cast %13 : vector<128xf32> to vector<1x128xf32>
    %60 = vector.broadcast %59 : vector<1x128xf32> to vector<16x128xf32>
    %61 = arith.mulf %58, %60 : vector<16x128xf32>
    %62 = arith.addf %56, %61 : vector<16x128xf32>
    %c127_i32_28 = arith.constant 127 : i32
    %63 = tpu.dynamic_rotate %58 by %c127_i32_28 dim 1 : vector<16x128xf32>, i32 -> vector<16x128xf32>
    %64 = vector.shape_cast %15 : vector<128xf32> to vector<1x128xf32>
    %65 = vector.broadcast %64 : vector<1x128xf32> to vector<16x128xf32>
    %66 = arith.mulf %63, %65 : vector<16x128xf32>
    %67 = arith.addf %62, %66 : vector<16x128xf32>
    %c126_i32_29 = arith.constant 126 : i32
    %68 = tpu.dynamic_rotate %58 by %c126_i32_29 dim 1 : vector<16x128xf32>, i32 -> vector<16x128xf32>
    %69 = vector.shape_cast %17 : vector<128xf32> to vector<1x128xf32>
    %70 = vector.broadcast %69 : vector<1x128xf32> to vector<16x128xf32>
    %71 = arith.mulf %68, %70 : vector<16x128xf32>
    %72 = arith.addf %67, %71 : vector<16x128xf32>
    %73 = vector.extract_strided_slice %72 {offsets = [0, 0], sizes = [16, 16], strides = [1, 1]} : vector<16x128xf32> to vector<16x16xf32>
    %74 = tpu.concatenate %73, %73 in 1 : vector<16x16xf32>, vector<16x16xf32> -> vector<16x32xf32>
    %75 = tpu.concatenate %74, %74 in 1 : vector<16x32xf32>, vector<16x32xf32> -> vector<16x64xf32>
    %76 = tpu.concatenate %75, %75 in 1 : vector<16x64xf32>, vector<16x64xf32> -> vector<16x128xf32>
    %77 = vector.shape_cast %19 : vector<128xf32> to vector<1x128xf32>
    %78 = vector.broadcast %77 : vector<1x128xf32> to vector<16x128xf32>
    %79 = arith.mulf %76, %78 : vector<16x128xf32>
    %80 = vector.extract_strided_slice %72 {offsets = [0, 18], sizes = [16, 16], strides = [1, 1]} : vector<16x128xf32> to vector<16x16xf32>
    %81 = tpu.concatenate %80, %80 in 1 : vector<16x16xf32>, vector<16x16xf32> -> vector<16x32xf32>
    %82 = tpu.concatenate %81, %81 in 1 : vector<16x32xf32>, vector<16x32xf32> -> vector<16x64xf32>
    %83 = tpu.concatenate %82, %82 in 1 : vector<16x64xf32>, vector<16x64xf32> -> vector<16x128xf32>
    %84 = vector.shape_cast %21 : vector<128xf32> to vector<1x128xf32>
    %85 = vector.broadcast %84 : vector<1x128xf32> to vector<16x128xf32>
    %86 = arith.mulf %83, %85 : vector<16x128xf32>
    %87 = arith.addf %79, %86 : vector<16x128xf32>
    %88 = vector.extract_strided_slice %72 {offsets = [0, 36], sizes = [16, 16], strides = [1, 1]} : vector<16x128xf32> to vector<16x16xf32>
    %89 = tpu.concatenate %88, %88 in 1 : vector<16x16xf32>, vector<16x16xf32> -> vector<16x32xf32>
    %90 = tpu.concatenate %89, %89 in 1 : vector<16x32xf32>, vector<16x32xf32> -> vector<16x64xf32>
    %91 = tpu.concatenate %90, %90 in 1 : vector<16x64xf32>, vector<16x64xf32> -> vector<16x128xf32>
    %92 = vector.shape_cast %23 : vector<128xf32> to vector<1x128xf32>
    %93 = vector.broadcast %92 : vector<1x128xf32> to vector<16x128xf32>
    %94 = arith.mulf %91, %93 : vector<16x128xf32>
    %95 = arith.addf %87, %94 : vector<16x128xf32>
    %96 = vector.extract_strided_slice %72 {offsets = [0, 54], sizes = [16, 16], strides = [1, 1]} : vector<16x128xf32> to vector<16x16xf32>
    %97 = tpu.concatenate %96, %96 in 1 : vector<16x16xf32>, vector<16x16xf32> -> vector<16x32xf32>
    %98 = tpu.concatenate %97, %97 in 1 : vector<16x32xf32>, vector<16x32xf32> -> vector<16x64xf32>
    %99 = tpu.concatenate %98, %98 in 1 : vector<16x64xf32>, vector<16x64xf32> -> vector<16x128xf32>
    %100 = vector.shape_cast %25 : vector<128xf32> to vector<1x128xf32>
    %101 = vector.broadcast %100 : vector<1x128xf32> to vector<16x128xf32>
    %102 = arith.mulf %99, %101 : vector<16x128xf32>
    %103 = arith.addf %95, %102 : vector<16x128xf32>
    %c0_30 = arith.constant 0 : index
    %c0_31 = arith.constant 0 : index
    %c0_32 = arith.constant 0 : index
    %104 = vector.load %arg4[%c0_30, %c0_31, %c0_32] : memref<2x16x128xf32, #tpu.memory_space<vmem>>, vector<1x16x128xf32>
    %105 = vector.shape_cast %104 : vector<1x16x128xf32> to vector<16x128xf32>
    %106 = vector.shape_cast %103 : vector<16x128xf32> to vector<1x16x128xf32>
    tpu.vector_store %arg4[%c0_30, %c0_31, %c0_32], %106 {strides = array<i32>} : memref<2x16x128xf32, #tpu.memory_space<vmem>>, vector<1x16x128xf32>,
    %c1_33 = arith.constant 1 : index
    %c0_34 = arith.constant 0 : index
    %c0_35 = arith.constant 0 : index
    %107 = vector.load %arg1[%c1_33, %c0_34, %c0_35] : memref<2x18x128xf32, #tpu.memory_space<vmem>>, vector<1x16x128xf32>
    %108 = vector.shape_cast %107 : vector<1x16x128xf32> to vector<16x128xf32>
    %109 = vector.shape_cast %1 : vector<128xf32> to vector<1x128xf32>
    %110 = vector.broadcast %109 : vector<1x128xf32> to vector<16x128xf32>
    %111 = arith.mulf %108, %110 : vector<16x128xf32>
    %c127_i32_36 = arith.constant 127 : i32
    %112 = tpu.dynamic_rotate %108 by %c127_i32_36 dim 1 : vector<16x128xf32>, i32 -> vector<16x128xf32>
    %113 = vector.shape_cast %3 : vector<128xf32> to vector<1x128xf32>
    %114 = vector.broadcast %113 : vector<1x128xf32> to vector<16x128xf32>
    %115 = arith.mulf %112, %114 : vector<16x128xf32>
    %116 = arith.addf %111, %115 : vector<16x128xf32>
    %c126_i32_37 = arith.constant 126 : i32
    %117 = tpu.dynamic_rotate %108 by %c126_i32_37 dim 1 : vector<16x128xf32>, i32 -> vector<16x128xf32>
    %118 = vector.shape_cast %5 : vector<128xf32> to vector<1x128xf32>
    %119 = vector.broadcast %118 : vector<1x128xf32> to vector<16x128xf32>
    %120 = arith.mulf %117, %119 : vector<16x128xf32>
    %121 = arith.addf %116, %120 : vector<16x128xf32>
    %c1_38 = arith.constant 1 : index
    %c1_39 = arith.constant 1 : index
    %c0_40 = arith.constant 0 : index
    %122 = vector.load %arg1[%c1_38, %c1_39, %c0_40] : memref<2x18x128xf32, #tpu.memory_space<vmem>>, vector<1x16x128xf32>
    %123 = vector.shape_cast %122 : vector<1x16x128xf32> to vector<16x128xf32>
    %124 = vector.shape_cast %7 : vector<128xf32> to vector<1x128xf32>
    %125 = vector.broadcast %124 : vector<1x128xf32> to vector<16x128xf32>
    %126 = arith.mulf %123, %125 : vector<16x128xf32>
    %127 = arith.addf %121, %126 : vector<16x128xf32>
    %c127_i32_41 = arith.constant 127 : i32
    %128 = tpu.dynamic_rotate %123 by %c127_i32_41 dim 1 : vector<16x128xf32>, i32 -> vector<16x128xf32>
    %129 = vector.shape_cast %9 : vector<128xf32> to vector<1x128xf32>
    %130 = vector.broadcast %129 : vector<1x128xf32> to vector<16x128xf32>
    %131 = arith.mulf %128, %130 : vector<16x128xf32>
    %132 = arith.addf %127, %131 : vector<16x128xf32>
    %c126_i32_42 = arith.constant 126 : i32
    %133 = tpu.dynamic_rotate %123 by %c126_i32_42 dim 1 : vector<16x128xf32>, i32 -> vector<16x128xf32>
    %134 = vector.shape_cast %11 : vector<128xf32> to vector<1x128xf32>
    %135 = vector.broadcast %134 : vector<1x128xf32> to vector<16x128xf32>
    %136 = arith.mulf %133, %135 : vector<16x128xf32>
    %137 = arith.addf %132, %136 : vector<16x128xf32>
    %c1_43 = arith.constant 1 : index
    %c2_44 = arith.constant 2 : index
    %c0_45 = arith.constant 0 : index
    %138 = vector.load %arg1[%c1_43, %c2_44, %c0_45] : memref<2x18x128xf32, #tpu.memory_space<vmem>>, vector<1x16x128xf32>
    %139 = vector.shape_cast %138 : vector<1x16x128xf32> to vector<16x128xf32>
    %140 = vector.shape_cast %13 : vector<128xf32> to vector<1x128xf32>
    %141 = vector.broadcast %140 : vector<1x128xf32> to vector<16x128xf32>
    %142 = arith.mulf %139, %141 : vector<16x128xf32>
    %143 = arith.addf %137, %142 : vector<16x128xf32>
    %c127_i32_46 = arith.constant 127 : i32
    %144 = tpu.dynamic_rotate %139 by %c127_i32_46 dim 1 : vector<16x128xf32>, i32 -> vector<16x128xf32>
    %145 = vector.shape_cast %15 : vector<128xf32> to vector<1x128xf32>
    %146 = vector.broadcast %145 : vector<1x128xf32> to vector<16x128xf32>
    %147 = arith.mulf %144, %146 : vector<16x128xf32>
    %148 = arith.addf %143, %147 : vector<16x128xf32>
    %c126_i32_47 = arith.constant 126 : i32
    %149 = tpu.dynamic_rotate %139 by %c126_i32_47 dim 1 : vector<16x128xf32>, i32 -> vector<16x128xf32>
    %150 = vector.shape_cast %17 : vector<128xf32> to vector<1x128xf32>
    %151 = vector.broadcast %150 : vector<1x128xf32> to vector<16x128xf32>
    %152 = arith.mulf %149, %151 : vector<16x128xf32>
    %153 = arith.addf %148, %152 : vector<16x128xf32>
    %154 = vector.extract_strided_slice %153 {offsets = [0, 0], sizes = [16, 16], strides = [1, 1]} : vector<16x128xf32> to vector<16x16xf32>
    %155 = tpu.concatenate %154, %154 in 1 : vector<16x16xf32>, vector<16x16xf32> -> vector<16x32xf32>
    %156 = tpu.concatenate %155, %155 in 1 : vector<16x32xf32>, vector<16x32xf32> -> vector<16x64xf32>
    %157 = tpu.concatenate %156, %156 in 1 : vector<16x64xf32>, vector<16x64xf32> -> vector<16x128xf32>
    %158 = vector.shape_cast %19 : vector<128xf32> to vector<1x128xf32>
    %159 = vector.broadcast %158 : vector<1x128xf32> to vector<16x128xf32>
    %160 = arith.mulf %157, %159 : vector<16x128xf32>
    %161 = vector.extract_strided_slice %153 {offsets = [0, 18], sizes = [16, 16], strides = [1, 1]} : vector<16x128xf32> to vector<16x16xf32>
    %162 = tpu.concatenate %161, %161 in 1 : vector<16x16xf32>, vector<16x16xf32> -> vector<16x32xf32>
    %163 = tpu.concatenate %162, %162 in 1 : vector<16x32xf32>, vector<16x32xf32> -> vector<16x64xf32>
    %164 = tpu.concatenate %163, %163 in 1 : vector<16x64xf32>, vector<16x64xf32> -> vector<16x128xf32>
    %165 = vector.shape_cast %21 : vector<128xf32> to vector<1x128xf32>
    %166 = vector.broadcast %165 : vector<1x128xf32> to vector<16x128xf32>
    %167 = arith.mulf %164, %166 : vector<16x128xf32>
    %168 = arith.addf %160, %167 : vector<16x128xf32>
    %169 = vector.extract_strided_slice %153 {offsets = [0, 36], sizes = [16, 16], strides = [1, 1]} : vector<16x128xf32> to vector<16x16xf32>
    %170 = tpu.concatenate %169, %169 in 1 : vector<16x16xf32>, vector<16x16xf32> -> vector<16x32xf32>
    %171 = tpu.concatenate %170, %170 in 1 : vector<16x32xf32>, vector<16x32xf32> -> vector<16x64xf32>
    %172 = tpu.concatenate %171, %171 in 1 : vector<16x64xf32>, vector<16x64xf32> -> vector<16x128xf32>
    %173 = vector.shape_cast %23 : vector<128xf32> to vector<1x128xf32>
    %174 = vector.broadcast %173 : vector<1x128xf32> to vector<16x128xf32>
    %175 = arith.mulf %172, %174 : vector<16x128xf32>
    %176 = arith.addf %168, %175 : vector<16x128xf32>
    %177 = vector.extract_strided_slice %153 {offsets = [0, 54], sizes = [16, 16], strides = [1, 1]} : vector<16x128xf32> to vector<16x16xf32>
    %178 = tpu.concatenate %177, %177 in 1 : vector<16x16xf32>, vector<16x16xf32> -> vector<16x32xf32>
    %179 = tpu.concatenate %178, %178 in 1 : vector<16x32xf32>, vector<16x32xf32> -> vector<16x64xf32>
    %180 = tpu.concatenate %179, %179 in 1 : vector<16x64xf32>, vector<16x64xf32> -> vector<16x128xf32>
    %181 = vector.shape_cast %25 : vector<128xf32> to vector<1x128xf32>
    %182 = vector.broadcast %181 : vector<1x128xf32> to vector<16x128xf32>
    %183 = arith.mulf %180, %182 : vector<16x128xf32>
    %184 = arith.addf %176, %183 : vector<16x128xf32>
    %c1_48 = arith.constant 1 : index
    %c0_49 = arith.constant 0 : index
    %c0_50 = arith.constant 0 : index
    %185 = vector.load %arg4[%c1_48, %c0_49, %c0_50] : memref<2x16x128xf32, #tpu.memory_space<vmem>>, vector<1x16x128xf32>
    %186 = vector.shape_cast %185 : vector<1x16x128xf32> to vector<16x128xf32>
    %187 = vector.shape_cast %184 : vector<16x128xf32> to vector<1x16x128xf32>
    tpu.vector_store %arg4[%c1_48, %c0_49, %c0_50], %187 {strides = array<i32>} : memref<2x16x128xf32, #tpu.memory_space<vmem>>, vector<1x16x128xf32>,
    return
  }
  func.func @transform_0(%arg0: i32) -> (i32, i32, i32) {
    %c0_i32 = arith.constant 0 : i32
    %c0_i32_0 = arith.constant 0 : i32
    %c0_i32_1 = arith.constant 0 : i32
    return %arg0, %c0_i32, %c0_i32_0 : i32, i32, i32
  }
  func.func @transform_1(%arg0: i32) -> (i32, i32) {
    %c0_i32 = arith.constant 0 : i32
    %c0_i32_0 = arith.constant 0 : i32
    %c0_i32_1 = arith.constant 0 : i32
    return %c0_i32, %c0_i32_0 : i32, i32
  }
  func.func @transform_2(%arg0: i32) -> (i32, i32) {
    %c0_i32 = arith.constant 0 : i32
    %c0_i32_0 = arith.constant 0 : i32
    %c0_i32_1 = arith.constant 0 : i32
    return %c0_i32, %c0_i32_0 : i32, i32
  }
  func.func @transform_3(%arg0: i32) -> (i32, i32, i32) {
    %c0_i32 = arith.constant 0 : i32
    %c0_i32_0 = arith.constant 0 : i32
    %c0_i32_1 = arith.constant 0 : i32
    return %arg0, %c0_i32, %c0_i32_0 : i32, i32, i32
  }
}

</mosaic_0001>

<bundles_post_ra>
// kernel: tpu_custom_call.1
= control target key start
LH: loop header
LB: loop body
LE: loop exit
PB: predicated region body
PF: predicated region fallthrough
CT: control target
= control target key end

     0   :  { %s546_s14 = smov 126   ;;  %s547_s15 = smov 127   ;;  %s925_s0 = inlined_call_operand.vmem [shape: f32[2,18,128], index: 0, kind: input, shape index: {}]   ;;  %s926_s1 = inlined_call_operand.vmem [shape: f32[9,128], index: 1, kind: input, shape index: {}]   ;;  %s927_s2 = inlined_call_operand.vmem [shape: f32[4,128], index: 2, kind: input, shape index: {}]   ;;  %s928_s3 = inlined_call_operand.hbm [shape: f32[2,16,128], index: 3, kind: output, shape index: {}]  }
   0x1   :  { %v28_v0 = vld [vmem:[%s925_s0] sm:$0xff]  ;;  %v29_v2 = vld [vmem:[%s925_s0 + $0x8] sm:$0xff] }
   0x2   :  { %42 = vrot.lane.b32.xlu1 %v28_v0, %s546_s14  ;;  %33 = vrot.lane.b32.xlu0 %v28_v0, %s547_s15  ;;  %v51_v1 = vld [vmem:[%s925_s0 + $0x1] sm:$0xff] }
   0x3   :  { %58 = vrot.lane.b32.xlu2 %v51_v1, %s547_s15 }
   0x4   :  { %8 = vsyncpa [#allocation3], 0  ;;  %v52_v3 = vld [vmem:[%s925_s0 + $0x9] sm:$0xff]  ;;  %v612_v6 = vld [vmem:[%s925_s0 + $0x18] sm:$0xff]  ;;  %s548_s29 = smov 16   ;;  %s550_s30 = smov 110  }
   0x5   :  { %v76_v4 = vld [vmem:[%s925_s0 + $0x2] sm:$0xff]  ;;  %v77_v5 = vld [vmem:[%s925_s0 + $0xa] sm:$0xff]  ;;  %v637_v9 = vld [vmem:[%s925_s0 + $0x19] sm:$0xff]  ;;  %s551_s4 = smov 108   ;;  %s552_s5 = smov 74   ;;  %vm109_vm0 = vcmask 130048  }
   0x6   :  { %v621_v7 = vld [vmem:[%s925_s0 + $0x20] sm:$0xff]  ;;  %v721_v58 = vld [vmem:[%s926_s1 + $0x8] ss:$0 sm:$0xff]  ;;  %s553_s6 = smov 90   ;;  %vm120_vm1 = vcmask 261120   ;;  %s555_s7 = smov 64  }
   0x7   :  { %v628_v8 = vld [vmem:[%s925_s0 + $0x21] sm:$0xff]  ;;  %v666_v14 = vld [vmem:[%s926_s1] ss:$0 sm:$0xff]  ;;  %vm131_vm2 = vcmask 523264   ;;  %s476_s19 = sshll.u32 %s928_s3, 4  ;;  %s557_s20 = smov 128   ;;  %s477_s19 = int_to_ptr.hbm [resolvable:$true] %s476_s19 }
   0x8   :  { %v644_v10 = vld [vmem:[%s925_s0 + $0x1a] sm:$0xff]  ;;  %v655_v11 = vld [vmem:[%s925_s0 + $0x22] sm:$0xff]  ;;  %v31_v16 = vmul.f32 %v666_v14, %v28_v0  ;;  %v32_v27 = vmul.f32 %v666_v14, %v29_v2  ;;  %s558_s21 = smov 8  }
   0x9   :  { %v671_v15 = vld [vmem:[%s926_s1 + $0x1] ss:$0 sm:$0xff]  ;;  %v677_v17 = vld [vmem:[%s926_s1 + $0x3] ss:$0 sm:$0xff]  ;;  %v682_v19 = vld [vmem:[%s926_s1 + $0x2] ss:$0 sm:$0xff] }
   0xa   :  { %44 = vrot.lane.b32.xlu1 %v29_v2, %s546_s14  ;;  %35 = vrot.lane.b32.xlu0 %v29_v2, %s547_s15  ;;  %v54_v23 = vmul.f32 %v677_v17, %v51_v1  ;;  %v55_v33 = vmul.f32 %v677_v17, %v52_v3  ;;  %v693_v34 = vld [vmem:[%s926_s1 + $0x4] ss:$0 sm:$0xff]  ;;  %v699_v37 = vld [vmem:[%s926_s1 + $0x6] ss:$0 sm:$0xff] }
   0xb   :  { %60 = vrot.lane.b32.xlu2 %v52_v3, %s547_s15  ;;  %v704_v38 = vld [vmem:[%s926_s1 + $0x5] ss:$0 sm:$0xff]  ;;  %v79_v44 = vmul.f32 %v699_v37, %v76_v4  ;;  %v80_v47 = vmul.f32 %v699_v37, %v77_v5  ;;  %v715_v51 = vld [vmem:[%s926_s1 + $0x7] ss:$0 sm:$0xff]  ;;  %s549_s1 = smov 92  }
  0x12   :  { %69 = vrot.lane.b32.xlu1 %v52_v3, %s546_s14  ;;  %67 = vrot.lane.b32.xlu0 %v51_v1, %s546_s14 }
  0x13   :  { %83 = vrot.lane.b32.xlu2 %v76_v4, %s547_s15 }
  0x1a   :  { %92 = vrot.lane.b32.xlu1 %v76_v4, %s546_s14  ;;  %85 = vrot.lane.b32.xlu0 %v77_v5, %s547_s15 }
  0x1b   :  { %94 = vrot.lane.b32.xlu2 %v77_v5, %s546_s14  ;;  %v259_v5 = vmul.f32 %v666_v14, %v612_v6 }
  0x22   :  { %261 = vrot.lane.b32.xlu1 %v612_v6, %s547_s15  ;;  %269 = vrot.lane.b32.xlu0 %v612_v6, %s546_s14 }
  0x23   :  { %263 = vrot.lane.b32.xlu2 %v621_v7, %s547_s15 }
  0x2a   :  { %271 = vrot.lane.b32.xlu1 %v621_v7, %s546_s14  ;;  %285 = vrot.lane.b32.xlu0 %v628_v8, %s547_s15 }
  0x2b   :  { %283 = vrot.lane.b32.xlu2 %v637_v9, %s547_s15 }
  0x32   :  { %291 = vrot.lane.b32.xlu1 %v637_v9, %s546_s14  ;;  %305 = vrot.lane.b32.xlu0 %v644_v10, %s547_s15 }
  0x33   :  { %293 = vrot.lane.b32.xlu2 %v628_v8, %s546_s14 }
  0x3a   :  { %307 = vrot.lane.b32.xlu1 %v655_v11, %s547_s15  ;;  %315 = vrot.lane.b32.xlu0 %v655_v11, %s546_s14 }
  0x3b   :  { %313 = vrot.lane.b32.xlu2 %v644_v10, %s546_s14 }
  0x5d   :  { %v59_v12 = vpop.permute.xlu2 %58 }
  0x5e   :  { %v63_v40 = vmul.f32 %v693_v34, %v59_v12 }
  0x65   :  { %v61_v13 = vpop.permute.xlu2 %60 }
  0x66   :  { %v64_v41 = vmul.f32 %v693_v34, %v61_v13 }
  0x6d   :  { %v84_v20 = vpop.permute.xlu2 %83 }
  0x6e   :  { %v88_v57 = vmul.f32 %v715_v51, %v84_v20  ;;  %v279_v20 = vmul.f32 %v677_v17, %v637_v9 }
  0x74   :  { %v43_v18 = vpop.permute.xlu1 %42  ;;  %v34_v21 = vpop.permute.xlu0 %33 }
  0x75   :  { %v38_v22 = vmul.f32 %v671_v15, %v34_v21  ;;  %v47_v24 = vmul.f32 %v682_v19, %v43_v18  ;;  %v95_v32 = vpop.permute.xlu2 %94 }
  0x76   :  { %v98_v1 = vmul.f32 %v721_v58, %v95_v32  ;;  %v302_v32 = vmul.f32 %v699_v37, %v655_v11 }
  0x77   :  { %v40_v25 = vadd.f32 %v38_v22, %v31_v16  ;;  %v260_v22 = vmul.f32 %v666_v14, %v621_v7  ;;  %v280_v7 = vmul.f32 %v677_v17, %v628_v8  ;;  %v301_v17 = vmul.f32 %v699_v37, %v644_v10 }
  0x79   :  { %v49_v26 = vadd.f32 %v47_v24, %v40_v25 }
  0x7b   :  { %v56_v29 = vadd.f32 %v54_v23, %v49_v26 }
  0x7c   :  { %v45_v28 = vpop.permute.xlu1 %44  ;;  %v36_v30 = vpop.permute.xlu0 %35 }
  0x7d   :  { %v39_v31 = vmul.f32 %v671_v15, %v36_v30  ;;  %v48_v35 = vmul.f32 %v682_v19, %v45_v28  ;;  %v65_v49 = vadd.f32 %v63_v40, %v56_v29  ;;  %v264_v54 = vpop.permute.xlu2 %263 }
  0x7e   :  { %v266_v23 = vmul.f32 %v671_v15, %v264_v54 }
  0x7f   :  { %v41_v36 = vadd.f32 %v39_v31, %v32_v27 }
  0x80   :  { %v268_v14 = vadd.f32 %v266_v23, %v260_v22 }
  0x81   :  { %v50_v39 = vadd.f32 %v48_v35, %v41_v36 }
  0x83   :  { %v57_v43 = vadd.f32 %v55_v33, %v50_v39 }
  0x84   :  { %v70_v42 = vpop.permute.xlu1 %69  ;;  %v68_v46 = vpop.permute.xlu0 %67 }
  0x85   :  { %v73_v45 = vmul.f32 %v704_v38, %v70_v42  ;;  %v66_v48 = vadd.f32 %v64_v41, %v57_v43  ;;  %v72_v50 = vmul.f32 %v704_v38, %v68_v46  ;;  %v284_v4 = vpop.permute.xlu2 %283 }
  0x86   :  { %v287_v29 = vmul.f32 %v693_v34, %v284_v4 }
  0x87   :  { %v75_v52 = vadd.f32 %v73_v45, %v66_v48  ;;  %v74_v53 = vadd.f32 %v72_v50, %v65_v49 }
  0x89   :  { %v81_v55 = vadd.f32 %v79_v44, %v74_v53  ;;  %v82_v56 = vadd.f32 %v80_v47, %v75_v52 }
  0x8b   :  { %v90_v60 = vadd.f32 %v88_v57, %v81_v55 }
  0x8c   :  { %v93_v59 = vpop.permute.xlu1 %92  ;;  %v86_v62 = vpop.permute.xlu0 %85 }
  0x8d   :  { %v97_v61 = vmul.f32 %v721_v58, %v93_v59  ;;  %v89_v63 = vmul.f32 %v715_v51, %v86_v62  ;;  %v294_v25 = vpop.permute.xlu2 %293 }
  0x8e   :  { %v296_v31 = vmul.f32 %v704_v38, %v294_v25 }
  0x8f   :  { %v725_v0 = vadd.f32 %v97_v61, %v90_v60  ;;  %v91_v2 = vadd.f32 %v89_v63, %v82_v56 }
  0x91   :  { %143 = vrot.lane.b32.xlu2 %v725_v0, %s546_s14  ;;  %103 = vrot.lane.b32.xlu0 %v725_v0, %s548_s29  ;;  %v732_v3 = vadd.f32 %v98_v1, %v91_v2 }
  0x93   :  { %105 = vrot.lane.b32.xlu1 %v732_v3, %s548_s29 }
  0x94   :  { %v262_v12 = vpop.permute.xlu1 %261  ;;  %v270_v16 = vpop.permute.xlu0 %269 }
  0x95   :  { %v265_v13 = vmul.f32 %v671_v15, %v262_v12  ;;  %v273_v18 = vmul.f32 %v682_v19, %v270_v16  ;;  %v314_v39 = vpop.permute.xlu2 %313 }
  0x96   :  { %v317_v43 = vmul.f32 %v721_v58, %v314_v39 }
  0x97   :  { %v267_v21 = vadd.f32 %v265_v13, %v259_v5 }
  0x99   :  { %v275_v24 = vadd.f32 %v273_v18, %v267_v21  ;;  %176 = vrot.lane.b32.xlu2 %v725_v0, %s549_s1  ;;  %137 = vrot.lane.b32.xlu0 %v725_v0, %s550_s30 }
  0x9b   :  { %v281_v6 = vadd.f32 %v279_v20, %v275_v24  ;;  %139 = vrot.lane.b32.xlu1 %v732_v3, %s550_s30 }
  0x9c   :  { %v272_v9 = vpop.permute.xlu1 %271  ;;  %v286_v26 = vpop.permute.xlu0 %285 }
  0x9d   :  { %v274_v15 = vmul.f32 %v682_v19, %v272_v9  ;;  %v288_v28 = vmul.f32 %v693_v34, %v286_v26  ;;  %v289_v19 = vadd.f32 %v287_v29, %v281_v6 }
  0x9f   :  { %v276_v27 = vadd.f32 %v274_v15, %v268_v14 }
  0xa1   :  { %v282_v30 = vadd.f32 %v280_v7, %v276_v27  ;;  %145 = vrot.lane.b32.xlu0 %v732_v3, %s546_s14 }
  0xa3   :  { %v290_v33 = vadd.f32 %v288_v28, %v282_v30  ;;  %182 = vrot.lane.b32.xlu1 %v725_v0, %s551_s4 }
  0xa4   :  { %v292_v8 = vpop.permute.xlu1 %291  ;;  %v306_v36 = vpop.permute.xlu0 %305 }
  0xa5   :  { %v298_v34 = vadd.f32 %v296_v31, %v290_v33  ;;  %v295_v35 = vmul.f32 %v704_v38, %v292_v8  ;;  %v309_v41 = vmul.f32 %v715_v51, %v306_v36 }
  0xa7   :  { %v297_v40 = vadd.f32 %v295_v35, %v289_v19  ;;  %v304_v42 = vadd.f32 %v302_v32, %v298_v34 }
  0xa9   :  { %v303_v11 = vadd.f32 %v301_v17, %v297_v40  ;;  %178 = vrot.lane.b32.xlu0 %v732_v3, %s549_s1 }
  0xab   :  { %v311_v44 = vadd.f32 %v309_v41, %v303_v11 }
  0xac   :  { %v308_v45 = vpop.permute.xlu1 %307  ;;  %v316_v37 = vpop.permute.xlu0 %315 }
  0xad   :  { %v319_v46 = vadd.f32 %v317_v43, %v311_v44  ;;  %v310_v10 = vmul.f32 %v715_v51, %v308_v45  ;;  %v318_v38 = vmul.f32 %v721_v58, %v316_v37 }
  0xaf   :  { %v312_v47 = vadd.f32 %v310_v10, %v304_v42  ;;  %353 = vrot.lane.b32.xlu1 %v319_v46, %s550_s30  ;;  %323 = vrot.lane.b32.xlu2 %v319_v46, %s548_s29 }
  0xb1   :  { %v320_v48 = vadd.f32 %v318_v38, %v312_v47 }
  0xb3   :  { %325 = vrot.lane.b32.xlu0 %v320_v48, %s548_s29 }
  0xb7   :  { %361 = vrot.lane.b32.xlu1 %v320_v48, %s546_s14  ;;  %355 = vrot.lane.b32.xlu2 %v320_v48, %s550_s30 }
  0xbb   :  { %359 = vrot.lane.b32.xlu0 %v319_v46, %s546_s14  ;;  %s554_s14 = smov 32  }
  0xbf   :  { %393 = vrot.lane.b32.xlu1 %v320_v48, %s549_s1  ;;  %184 = vrot.lane.b32.xlu2 %v732_v3, %s551_s4 }
  0xc3   :  { %391 = vrot.lane.b32.xlu0 %v319_v46, %s549_s1 }
  0xc7   :  { %215 = vrot.lane.b32.xlu1 %v725_v0, %s552_s5  ;;  %397 = vrot.lane.b32.xlu2 %v319_v46, %s551_s4 }
  0xcb   :  { %399 = vrot.lane.b32.xlu0 %v320_v48, %s551_s4 }
  0xcf   :  { %223 = vrot.lane.b32.xlu1 %v732_v3, %s553_s6  ;;  %217 = vrot.lane.b32.xlu2 %v732_v3, %s552_s5 }
  0xd3   :  { %221 = vrot.lane.b32.xlu0 %v725_v0, %s553_s6 }
  0xd7   :  { %435 = vrot.lane.b32.xlu1 %v319_v46, %s553_s6  ;;  %429 = vrot.lane.b32.xlu2 %v319_v46, %s552_s5 }
  0xdb   :  { %431 = vrot.lane.b32.xlu0 %v320_v48, %s552_s5 }
  0xdf   :  { %437 = vrot.lane.b32.xlu2 %v320_v48, %s553_s6 }
  0xeb   :  { %v144_v49 = vpop.permute.xlu2 %143 }
  0xf3   :  { %v177_v51 = vpop.permute.xlu2 %176 }
 0x103   :  { %v104_v50 = vpop.permute.xlu0 %103 }
 0x104   :  { %v110_v52 = vsel %vm109_vm0, %v725_v0, %v104_v50 }
 0x105   :  { %114 = vrot.lane.b32.xlu2 %v110_v52, %s554_s14  ;;  %v106_v53 = vpop.permute.xlu1 %105 }
 0x106   :  { %v793_v54 = vsel %vm109_vm0, %v732_v3, %v106_v53 }
 0x107   :  { %116 = vrot.lane.b32.xlu0 %v793_v54, %s554_s14 }
 0x109   :  { %v324_v56 = vpop.permute.xlu2 %323 }
 0x10a   :  { %v803_v59 = vsel %vm109_vm0, %v319_v46, %v324_v56 }
 0x10b   :  { %v138_v55 = vpop.permute.xlu0 %137 }
 0x10c   :  { %v798_v57 = vsel %vm109_vm0, %v138_v55, %v144_v49 }
 0x10d   :  { %153 = vrot.lane.b32.xlu1 %v798_v57, %s554_s14  ;;  %v140_v58 = vpop.permute.xlu1 %139 }
 0x10f   :  { %333 = vrot.lane.b32.xlu0 %v803_v59, %s554_s14 }
 0x111   :  { %v356_v63 = vpop.permute.xlu2 %355 }
 0x113   :  { %v146_v60 = vpop.permute.xlu0 %145 }
 0x114   :  { %v150_v61 = vsel %vm109_vm0, %v140_v58, %v146_v60 }
 0x115   :  { %155 = vrot.lane.b32.xlu2 %v150_v61, %s554_s14  ;;  %v183_v62 = vpop.permute.xlu1 %182 }
 0x116   :  { %v188_v16 = vsel %vm109_vm0, %v177_v51, %v183_v62 }
 0x119   :  { %v185_v2 = vpop.permute.xlu2 %184 }
 0x11b   :  { %v179_v0 = vpop.permute.xlu0 %178 }
 0x11c   :  { %v189_v23 = vsel %vm109_vm0, %v179_v0, %v185_v2 }
 0x121   :  { %v354_v1 = vpop.permute.xlu1 %353  ;;  %v398_v20 = vpop.permute.xlu2 %397 }
 0x125   :  { %v326_v3 = vpop.permute.xlu0 %325 }
 0x126   :  { %v330_v4 = vsel %vm109_vm0, %v320_v48, %v326_v3 }
 0x127   :  { %335 = vrot.lane.b32.xlu1 %v330_v4, %s554_s14 }
 0x129   :  { %v362_v5 = vpop.permute.xlu1 %361  ;;  %v218_v6 = vpop.permute.xlu2 %217 }
 0x12a   :  { %v366_v12 = vsel %vm109_vm0, %v356_v63, %v362_v5  ;;  %v516_v5 = vld [vmem:[%s927_s2] ss:$0 sm:$0xff] }
 0x12b   :  { %371 = vrot.lane.b32.xlu0 %v366_v12, %s554_s14 }
 0x12d   :  { %v360_v13 = vpop.permute.xlu0 %359 }
 0x12e   :  { %v365_v18 = vsel %vm109_vm0, %v354_v1, %v360_v13 }
 0x12f   :  { %192 = vrot.lane.b32.xlu1 %v188_v16, %s554_s14  ;;  %369 = vrot.lane.b32.xlu2 %v365_v18, %s554_s14 }
 0x131   :  { %v394_v21 = vpop.permute.xlu1 %393  ;;  %v430_v26 = vpop.permute.xlu2 %429 }
 0x135   :  { %v392_v22 = vpop.permute.xlu0 %391 }
 0x136   :  { %v403_v24 = vsel %vm109_vm0, %v392_v22, %v398_v20  ;;  %v518_v22 = vld [vmem:[%s927_s2 + $0x2] ss:$0 sm:$0xff] }
 0x137   :  { %194 = vrot.lane.b32.xlu2 %v189_v23, %s554_s14  ;;  %407 = vrot.lane.b32.xlu0 %v403_v24, %s554_s14 }
 0x139   :  { %v216_v9 = vpop.permute.xlu1 %215  ;;  %v438_v31 = vpop.permute.xlu2 %437 }
 0x13d   :  { %v400_v25 = vpop.permute.xlu0 %399 }
 0x13e   :  { %v404_v7 = vsel %vm109_vm0, %v394_v21, %v400_v25 }
 0x13f   :  { %409 = vrot.lane.b32.xlu1 %v404_v7, %s554_s14 }
 0x141   :  { %v224_v14 = vpop.permute.xlu1 %223 }
 0x142   :  { %v228_v15 = vsel %vm109_vm0, %v218_v6, %v224_v14 }
 0x143   :  { %233 = vrot.lane.b32.xlu0 %v228_v15, %s554_s14 }
 0x145   :  { %v222_v27 = vpop.permute.xlu0 %221 }
 0x146   :  { %v227_v28 = vsel %vm109_vm0, %v216_v9, %v222_v27 }
 0x147   :  { %231 = vrot.lane.b32.xlu2 %v227_v28, %s554_s14 }
 0x149   :  { %v436_v29 = vpop.permute.xlu1 %435 }
 0x14a   :  { %v441_v30 = vsel %vm109_vm0, %v430_v26, %v436_v29 }
 0x14b   :  { %445 = vrot.lane.b32.xlu1 %v441_v30, %s554_s14 }
 0x14d   :  { %v432_v32 = vpop.permute.xlu0 %431 }
 0x14e   :  { %v442_v33 = vsel %vm109_vm0, %v432_v32, %v438_v31 }
 0x14f   :  { %447 = vrot.lane.b32.xlu2 %v442_v33, %s554_s14 }
 0x15f   :  { %v115_v8 = vpop.permute.xlu2 %114 }
 0x160   :  { %v121_v17 = vsel %vm120_vm1, %v110_v52, %v115_v8 }
 0x161   :  { %125 = vrot.lane.b32.xlu1 %v121_v17, %s555_s7 }
 0x16f   :  { %v156_v19 = vpop.permute.xlu2 %155 }
 0x170   :  { %v834_v34 = vsel %vm120_vm1, %v150_v61, %v156_v19 }
 0x171   :  { %165 = vrot.lane.b32.xlu1 %v834_v34, %s555_s7 }
 0x179   :  { %v117_v35 = vpop.permute.xlu0 %116 }
 0x17a   :  { %v840_v36 = vsel %vm120_vm1, %v793_v54, %v117_v35 }
 0x17b   :  { %127 = vrot.lane.b32.xlu2 %v840_v36, %s555_s7 }
 0x17f   :  { %v154_v39 = vpop.permute.xlu1 %153 }
 0x180   :  { %v159_v40 = vsel %vm120_vm1, %v798_v57, %v154_v39 }
 0x181   :  { %163 = vrot.lane.b32.xlu0 %v159_v40, %s555_s7  ;;  %v334_v41 = vpop.permute.xlu0 %333 }
 0x182   :  { %v849_v42 = vsel %vm120_vm1, %v803_v59, %v334_v41 }
 0x189   :  { %v370_v11 = vpop.permute.xlu2 %369  ;;  %343 = vrot.lane.b32.xlu0 %v849_v42, %s555_s7 }
 0x18a   :  { %v854_v43 = vsel %vm120_vm1, %v365_v18, %v370_v11 }
 0x18b   :  { %379 = vrot.lane.b32.xlu2 %v854_v43, %s555_s7 }
 0x191   :  { %v195_v44 = vpop.permute.xlu2 %194 }
 0x192   :  { %v859_v45 = vsel %vm120_vm1, %v189_v23, %v195_v44  ;;  %v519_v23 = vld [vmem:[%s927_s2 + $0x3] ss:$0 sm:$0xff] }
 0x193   :  { %204 = vrot.lane.b32.xlu2 %v859_v45, %s555_s7 }
 0x199   :  { %v336_v46 = vpop.permute.xlu1 %335 }
 0x19a   :  { %v340_v10 = vsel %vm120_vm1, %v330_v4, %v336_v46 }
 0x19b   :  { %345 = vrot.lane.b32.xlu1 %v340_v10, %s555_s7 }
 0x19d   :  { %v372_v37 = vpop.permute.xlu0 %371 }
 0x19e   :  { %v376_v38 = vsel %vm120_vm1, %v366_v12, %v372_v37  ;;  %v517_v12 = vld [vmem:[%s927_s2 + $0x1] ss:$0 sm:$0xff]  ;;  %s556_s2 = smov [#allocation2]  }
 0x19f   :  { %381 = vrot.lane.b32.xlu0 %v376_v38, %s555_s7  ;;  %s474_s15 = sshll.u32 %s556_s2, 4  ;;  %s475_s15 = int_to_ptr.vmem [resolvable:$true] %s474_s15 }
 0x1a1   :  { %v193_v47 = vpop.permute.xlu1 %192  ;;  %v232_v48 = vpop.permute.xlu2 %231 }
 0x1a2   :  { %v198_v49 = vsel %vm120_vm1, %v188_v16, %v193_v47  ;;  %v237_v50 = vsel %vm120_vm1, %v227_v28, %v232_v48 }
 0x1a3   :  { %202 = vrot.lane.b32.xlu1 %v198_v49, %s555_s7  ;;  %241 = vrot.lane.b32.xlu2 %v237_v50, %s555_s7 }
 0x1a9   :  { %v448_v51 = vpop.permute.xlu2 %447  ;;  %v408_v52 = vpop.permute.xlu0 %407 }
 0x1aa   :  { %v452_v53 = vsel %vm120_vm1, %v442_v33, %v448_v51  ;;  %v873_v54 = vsel %vm120_vm1, %v403_v24, %v408_v52 }
 0x1ab   :  { %457 = vrot.lane.b32.xlu2 %v452_v53, %s555_s7  ;;  %417 = vrot.lane.b32.xlu0 %v873_v54, %s555_s7 }
 0x1b1   :  { %v410_v55 = vpop.permute.xlu1 %409 }
 0x1b2   :  { %v414_v56 = vsel %vm120_vm1, %v404_v7, %v410_v55 }
 0x1b3   :  { %419 = vrot.lane.b32.xlu1 %v414_v56, %s555_s7 }
 0x1b5   :  { %v234_v57 = vpop.permute.xlu0 %233 }
 0x1b6   :  { %v238_v58 = vsel %vm120_vm1, %v228_v15, %v234_v57 }
 0x1b7   :  { %243 = vrot.lane.b32.xlu0 %v238_v58, %s555_s7 }
 0x1bd   :  { %v446_v59 = vpop.permute.xlu1 %445 }
 0x1be   :  { %v883_v60 = vsel %vm120_vm1, %v441_v30, %v446_v59 }
 0x1bf   :  { %455 = vrot.lane.b32.xlu1 %v883_v60, %s555_s7 }
 0x1d3   :  { %v126_v62 = vpop.permute.xlu1 %125 }
 0x1d4   :  { %v132_v16 = vsel %vm131_vm2, %v121_v17, %v126_v62 }
 0x1d5   :  { %v128_v61 = vpop.permute.xlu2 %127  ;;  %v135_v21 = vmul.f32 %v516_v5, %v132_v16 }
 0x1d6   :  { %v133_v8 = vsel %vm131_vm2, %v840_v36, %v128_v61 }
 0x1d7   :  { %v136_v11 = vmul.f32 %v516_v5, %v133_v8 }
 0x1e3   :  { %v166_v0 = vpop.permute.xlu1 %165 }
 0x1e4   :  { %v170_v30 = vsel %vm131_vm2, %v834_v34, %v166_v0 }
 0x1e5   :  { %v380_v63 = vpop.permute.xlu2 %379  ;;  %v173_v19 = vmul.f32 %v517_v12, %v170_v30 }
 0x1e6   :  { %v385_v51 = vsel %vm131_vm2, %v854_v43, %v380_v63 }
 0x1ed   :  { %v205_v2 = vpop.permute.xlu2 %204 }
 0x1ee   :  { %v209_v17 = vsel %vm131_vm2, %v859_v45, %v205_v2 }
 0x1ef   :  { %v212_v44 = vmul.f32 %v518_v22, %v209_v17 }
 0x1f3   :  { %v164_v1 = vpop.permute.xlu0 %163 }
 0x1f4   :  { %v169_v4 = vsel %vm131_vm2, %v159_v40, %v164_v1 }
 0x1f5   :  { %v172_v18 = vmul.f32 %v517_v12, %v169_v4 }
 0x1f7   :  { %v174_v25 = vadd.f32 %v172_v18, %v135_v21 }
 0x1fb   :  { %v344_v13 = vpop.permute.xlu0 %343 }
 0x1fc   :  { %v349_v36 = vsel %vm131_vm2, %v849_v42, %v344_v13 }
 0x1fd   :  { %v242_v20 = vpop.permute.xlu2 %241 }
 0x1fe   :  { %v247_v6 = vsel %vm131_vm2, %v237_v50, %v242_v20 }
 0x1ff   :  { %v250_v14 = vmul.f32 %v519_v23, %v247_v6 }
 0x205   :  { %v458_v32 = vpop.permute.xlu2 %457 }
 0x206   :  { %v462_v40 = vsel %vm131_vm2, %v452_v53, %v458_v32  ;;  %v351_v53 = vmul.f32 %v516_v5, %v349_v36 }
 0x207   :  { %v464_v37 = vmul.f32 %v519_v23, %v462_v40 }
 0x20d   :  { %v346_v3 = vpop.permute.xlu1 %345 }
 0x20e   :  { %v350_v31 = vsel %vm131_vm2, %v340_v10, %v346_v3  ;;  %v175_v10 = vadd.f32 %v173_v19, %v136_v11 }
 0x20f   :  { %v352_v35 = vmul.f32 %v516_v5, %v350_v31 }
 0x210   :  { %v214_v48 = vadd.f32 %v212_v44, %v175_v10 }
 0x211   :  { %v382_v15 = vpop.permute.xlu0 %381 }
 0x212   :  { %v386_v28 = vsel %vm131_vm2, %v376_v38, %v382_v15 }
 0x213   :  { %v388_v33 = vmul.f32 %v517_v12, %v386_v28 }
 0x215   :  { %v203_v24 = vpop.permute.xlu1 %202  ;;  %v390_v34 = vadd.f32 %v388_v33, %v352_v35 }
 0x216   :  { %v208_v9 = vsel %vm131_vm2, %v198_v49, %v203_v24 }
 0x217   :  { %v211_v7 = vmul.f32 %v518_v22, %v208_v9 }
 0x219   :  { %v213_v26 = vadd.f32 %v211_v7, %v174_v25 }
 0x21b   :  { %v252_v27 = vadd.f32 %v250_v14, %v213_v26 }
 0x21d   :  { %254 = vst [vmem:[#allocation2] sm:$0xff] %v252_v27  ;;  %v418_v29 = vpop.permute.xlu0 %417 }
 0x21e   :  { %v423_v52 = vsel %vm131_vm2, %v873_v54, %v418_v29 }
 0x21f   :  { %v425_v57 = vmul.f32 %v518_v22, %v423_v52 }
 0x225   :  { %v420_v39 = vpop.permute.xlu1 %419 }
 0x226   :  { %v424_v41 = vsel %vm131_vm2, %v414_v56, %v420_v39  ;;  %v387_v56 = vmul.f32 %v517_v12, %v385_v51 }
 0x227   :  { %v426_v46 = vmul.f32 %v518_v22, %v424_v41 }
 0x228   :  { %v389_v59 = vadd.f32 %v387_v56, %v351_v53 }
 0x229   :  { %v428_v38 = vadd.f32 %v426_v46, %v390_v34  ;;  %v244_v47 = vpop.permute.xlu0 %243 }
 0x22a   :  { %v248_v45 = vsel %vm131_vm2, %v238_v58, %v244_v47  ;;  %v427_v43 = vadd.f32 %v425_v57, %v389_v59 }
 0x22b   :  { %v466_v49 = vadd.f32 %v464_v37, %v428_v38  ;;  %v251_v50 = vmul.f32 %v519_v23, %v248_v45 }
 0x22d   :  { %469 = vst [vmem:[#allocation2 + $0x18] sm:$0xff] %v466_v49  ;;  %v253_v55 = vadd.f32 %v251_v50, %v214_v48 }
 0x22f   :  { %255 = vst [vmem:[#allocation2 + $0x8] sm:$0xff] %v253_v55 }
 0x231   :  { %v456_v61 = vpop.permute.xlu1 %455 }
 0x232   :  { %v461_v42 = vsel %vm131_vm2, %v883_v60, %v456_v61 }
 0x233   :  { %v463_v58 = vmul.f32 %v519_v23, %v461_v42 }
 0x235   :  { %v465_v54 = vadd.f32 %v463_v58, %v427_v43 }
 0x237   :  { %468 = vst [vmem:[#allocation2 + $0x10] sm:$0xff] %v465_v54 }
 0x238   :  { %482 = dma.vmem_to_hbm [thread:$0]  %s475_s15, 512, %s477_s19, [#allocation3], %s557_s20, %s557_s20, %s558_s21  }
 0x239   :  { %544 = dma.done.wait [#allocation3], 512  }
 0x23a   :  { %545 = vsyncadd [#allocation3], 4294966784 }
 0x23b   :  { %487 = vsyncpa [#allocation3], 1 }

</bundles_post_ra>
